<compile_context>
chip_gen: v7x
topology: tpu7x:2x2x1
jax: 0.10.0
libtpu: 0.0.40
codegen_flags: <defaults>
</compile_context>

<pallas_src>
import numpy as np
import jax
import jax.numpy as jnp
from jax import lax
from jax.experimental import pallas as pl
from jax.experimental.pallas import tpu as pltpu


def get_rotary_matrix(context_window, embedding_dim):
    """Exact port of the PyTorch helper (including the (i-1) exponent quirk).
    Only used by the pure-JAX reference."""
    R = np.zeros((context_window, embedding_dim, embedding_dim), dtype=np.float32)
    for position in range(context_window):
        for i in range(embedding_dim // 2):
            theta = 10000.0 ** (-2.0 * (i - 1) / embedding_dim)
            m_theta = position * theta
            R[position, 2 * i, 2 * i] = np.cos(m_theta)
            R[position, 2 * i, 2 * i + 1] = -np.sin(m_theta)
            R[position, 2 * i + 1, 2 * i] = np.sin(m_theta)
            R[position, 2 * i + 1, 2 * i + 1] = np.cos(m_theta)
    return R


def make_rope_tables(context_window, embedding_dim):
    """cos/sin tables equivalent to the dense R:  x_rot = x*cos + pair_swap(x)*sin."""
    half = embedding_dim // 2
    i = np.arange(half, dtype=np.float64)
    theta = 10000.0 ** (-2.0 * (i - 1.0) / embedding_dim)        # keeps the (i-1) quirk
    ang = np.arange(context_window, dtype=np.float64)[:, None] * theta[None, :]  # (cw, d/2)
    cos = np.zeros((context_window, embedding_dim), np.float32)
    sin = np.zeros((context_window, embedding_dim), np.float32)
    cos[:, 0::2] = np.cos(ang)
    cos[:, 1::2] = np.cos(ang)
    sin[:, 0::2] = np.sin(ang)       # coefficient of partner x[2i+1] at lane 2i
    sin[:, 1::2] = -np.sin(ang)      # coefficient of partner x[2i]   at lane 2i+1
    return cos, sin


def _fused_rope_mha_kernel(x_ref, w_ref, cos_ref, sin_ref, wo_ref, bo_ref, o_ref):
    # x_ref  : (1, m, d)       one batch element (fp32)
    # w_ref  : (d, 5*h*d)      bf16 fused projection weights [Qs | Qs_pair | K | K_pair | V]
    #                          (Q columns pre-scaled by 1/sqrt(d), *_pair = column pairs swapped)
    # cos_ref/sin_ref : (m, h*d)  fp32 rotary tables (sin sign-folded), tiled per head
    # wo_ref : (h*d, d)        bf16 output projection (pre-transposed)
    # bo_ref : (1, d)          fp32 output bias
    # o_ref  : (1, m, d)       fp32 output
    m = x_ref.shape[1]
    d = x_ref.shape[2]
    hd = cos_ref.shape[1]
    h = hd // d

    # One lane-dense MXU matmul produces Q, pair-swapped Q, K, pair-swapped K and V
    # for all heads at once (fp32 accumulation).
    x = x_ref[0].astype(jnp.bfloat16)                                     # (m, d)
    proj = jnp.dot(x, w_ref[...], preferred_element_type=jnp.float32)     # (m, 5*h*d)

    q      = proj[:, 0 * hd:1 * hd]     # already scaled by 1/sqrt(d)
    q_pair = proj[:, 1 * hd:2 * hd]
    k      = proj[:, 2 * hd:3 * hd]
    k_pair = proj[:, 3 * hd:4 * hd]
    v      = proj[:, 4 * hd:5 * hd]

    # Rotary: pure elementwise fp32 (VPU); identical to bmm with the dense R.
    cos = cos_ref[...]
    sin = sin_ref[...]
    q_rot = q * cos + q_pair * sin
    k_rot = k * cos + k_pair * sin

    # Causal mask (diagonal always kept -> no fully-masked rows).
    row = lax.broadcasted_iota(jnp.int32, (m, m), 0)
    col = lax.broadcasted_iota(jnp.int32, (m, m), 1)
    causal = col <= row

    outs = []
    for hi in range(h):                      # static loop over heads (h small)
        sl = slice(hi * d, (hi + 1) * d)
        qh = q_rot[:, sl].astype(jnp.bfloat16)
        kh = k_rot[:, sl].astype(jnp.bfloat16)
        vh = v[:, sl].astype(jnp.bfloat16)
        # Contract last dims directly (transpose folded into the MXU operand fetch).
        s = lax.dot_general(qh, kh, (((1,), (1,)), ((), ())),
                            preferred_element_type=jnp.float32)           # (m, m) fp32
        s = jnp.where(causal, s, -jnp.inf)
        p = jnp.exp(s - jnp.max(s, axis=-1, keepdims=True))               # fp32 softmax
        attn = p * pl.reciprocal(jnp.sum(p, axis=-1, keepdims=True), approx=True)
        # TODO(synk): attention dropout (p=0.1) skipped — identity in inference mode.
        outs.append(jnp.dot(attn.astype(jnp.bfloat16), vh,
                            preferred_element_type=jnp.float32))          # (m, d)

    cat = jnp.concatenate(outs, axis=-1)                                  # (m, h*d)
    y = jnp.dot(cat.astype(jnp.bfloat16), wo_ref[...],
                preferred_element_type=jnp.float32) + bo_ref[...]
    # TODO(synk): output dropout (p=0.1) skipped — identity in inference mode.
    o_ref[0] = y


def rope_mha(x, wq, wk, wv, cos, sin, wo_t, bo):
    """x: (b, m, d); wq/wk/wv: (h, d, d) pre-transposed so q = x @ wq[h];
    cos/sin: (context_window, d) rotary tables; wo_t: (h*d, d); bo: (1, d)."""
    b, m, d = x.shape
    h = wq.shape[0]
    hd = h * d

    # ---- host-side parameter prep (would be done once for a real deployment) ----
    # column-pair permutation: x @ W[:, :, perm] == pair_swap(x @ W)
    perm = np.arange(d).reshape(-1, 2)[:, ::-1].reshape(-1)
    scale = np.float32(1.0 / np.sqrt(d))              # folded into the Q projection

    def stack(w):                                     # (h, d, d) -> (d, h*d), head-major cols
        return jnp.transpose(w, (1, 0, 2)).reshape(d, hd)

    wq_s = wq * scale
    w_fused = jnp.concatenate(
        [stack(wq_s), stack(wq_s[:, :, perm]),
         stack(wk),   stack(wk[:, :, perm]),
         stack(wv)], axis=1).astype(jnp.bfloat16)     # (d, 5*h*d)

    cos_t = jnp.tile(cos[:m], (1, h))                 # (m, h*d)
    sin_t = jnp.tile(sin[:m], (1, h))
    wo_bf = wo_t.astype(jnp.bfloat16)

    return pl.pallas_call(
        _fused_rope_mha_kernel,
        out_shape=jax.ShapeDtypeStruct((b, m, d), jnp.float32),
        grid=(b,),
        in_specs=[
            pl.BlockSpec((1, m, d), lambda bi: (bi, 0, 0)),     # x per batch element
            pl.BlockSpec((d, 5 * hd), lambda bi: (0, 0)),       # fused projection weights
            pl.BlockSpec((m, hd), lambda bi: (0, 0)),           # cos table
            pl.BlockSpec((m, hd), lambda bi: (0, 0)),           # sin table (sign-folded)
            pl.BlockSpec((hd, d), lambda bi: (0, 0)),           # output projection
            pl.BlockSpec((1, d), lambda bi: (0, 0)),            # output bias
        ],
        out_specs=pl.BlockSpec((1, m, d), lambda bi: (bi, 0, 0)),
        compiler_params=pltpu.CompilerParams(
            dimension_semantics=("parallel",)),
    )(x, w_fused, cos_t, sin_t, wo_bf, bo)


def rope_mha_reference(x, wq, wk, wv, R, wo_t, bo):
    """Pure-JAX reference mirroring the PyTorch forward (dropout = identity)."""
    b, m, d = x.shape
    h = wq.shape[0]
    hi = lax.Precision.HIGHEST
    outs = []
    for hd in range(h):
        q = jnp.einsum('bmi,ij->bmj', x, wq[hd], precision=hi)
        k = jnp.einsum('bmi,ij->bmj', x, wk[hd], precision=hi)
        v = jnp.einsum('bmi,ij->bmj', x, wv[hd], precision=hi)
        q_rot = jnp.einsum('bpi,pij->bpj', q, R[:m], precision=hi)
        k_rot = jnp.einsum('bpi,pij->bpj', k, R[:m], precision=hi)
        scores = jnp.einsum('bqd,bkd->bqk', q_rot, k_rot, precision=hi) / np.sqrt(d)
        mask = np.tril(np.ones((m, m), dtype=bool))
        scores = jnp.where(mask, scores, -jnp.inf)
        attn = jax.nn.softmax(scores, axis=-1)
        outs.append(jnp.einsum('bqk,bkd->bqd', attn, v, precision=hi))
    cat = jnp.concatenate(outs, axis=-1)
    return jnp.einsum('bmi,ij->bmj', cat, wo_t, precision=hi) + bo[0]


if __name__ == "__main__":
    # config (small, consistent with the module)
    d_model = 32
    context_window = 16
    n_heads = 4
    batch = 2
    seq = 8

    key = jax.random.PRNGKey(0)
    k_x, k_q, k_k, k_v, k_o, k_b = jax.random.split(key, 6)

    x = jax.random.normal(k_x, (batch, seq, d_model), dtype=jnp.float32)

    # Deterministic synthetic parameters (shapes from the module's __init__).
    wq = jax.random.normal(k_q, (n_heads, d_model, d_model), jnp.float32) / np.sqrt(d_model)
    wk = jax.random.normal(k_k, (n_heads, d_model, d_model), jnp.float32) / np.sqrt(d_model)
    wv = jax.random.normal(k_v, (n_heads, d_model, d_model), jnp.float32) / np.sqrt(d_model)
    wo_t = jax.random.normal(k_o, (n_heads * d_model, d_model), jnp.float32) / np.sqrt(n_heads * d_model)
    bo = jax.random.normal(k_b, (1, d_model), jnp.float32) * 0.01

    cos_np, sin_np = make_rope_tables(context_window, d_model)
    cos = jnp.asarray(cos_np)
    sin = jnp.asarray(sin_np)
    R = jnp.asarray(get_rotary_matrix(context_window, d_model))   # reference only

    out = jax.block_until_ready(rope_mha(x, wq, wk, wv, cos, sin, wo_t, bo))

    ref = jax.block_until_ready(rope_mha_reference(x, wq, wk, wv, R, wo_t, bo))
    # Tolerance covers bf16 MXU operands with fp32 accumulation (reference is fp32 HIGHEST).
    np.testing.assert_allclose(np.asarray(out), np.asarray(ref), rtol=5e-2, atol=5e-2)

    print("KERNEL_OK")
</pallas_src>

<mosaic_0001>
module attributes {stable_mosaic.version = 11 : i64} {
  func.func @_fused_rope_mha_kernel(%arg0: i32, %arg1: memref<1x8x32xf32, #tpu.memory_space<vmem>>, %arg2: memref<32x640xbf16, #tpu.memory_space<vmem>>, %arg3: memref<8x128xf32, #tpu.memory_space<vmem>>, %arg4: memref<8x128xf32, #tpu.memory_space<vmem>>, %arg5: memref<128x32xbf16, #tpu.memory_space<vmem>>, %arg6: memref<1x32xf32, #tpu.memory_space<vmem>>, %arg7: memref<1x8x32xf32, #tpu.memory_space<vmem>>) attributes {dimension_semantics = [#tpu.dimension_semantics<parallel>], iteration_bounds = array<i64: 2>, scalar_prefetch = 0 : i64, scratch_operands = 0 : i64, tpu.core_type = #tpu.core_type<tc>, window_params = [{transform_indices = @transform_0, window_bounds = array<i64: 1, 8, 32>}, {pipeline_mode = #tpu.pipeline_mode<synchronous>, transform_indices = @transform_1, window_bounds = array<i64: 32, 640>}, {pipeline_mode = #tpu.pipeline_mode<synchronous>, transform_indices = @transform_2, window_bounds = array<i64: 8, 128>}, {pipeline_mode = #tpu.pipeline_mode<synchronous>, transform_indices = @transform_3, window_bounds = array<i64: 8, 128>}, {pipeline_mode = #tpu.pipeline_mode<synchronous>, transform_indices = @transform_4, window_bounds = array<i64: 128, 32>}, {pipeline_mode = #tpu.pipeline_mode<synchronous>, transform_indices = @transform_5, window_bounds = array<i64: 1, 32>}, {transform_indices = @transform_6, window_bounds = array<i64: 1, 8, 32>}]} {
    %c0 = arith.constant 0 : index
    %c0_0 = arith.constant 0 : index
    %c0_1 = arith.constant 0 : index
    %0 = vector.load %arg1[%c0, %c0_0, %c0_1] : memref<1x8x32xf32, #tpu.memory_space<vmem>>, vector<1x8x32xf32>
    %1 = vector.shape_cast %0 : vector<1x8x32xf32> to vector<8x32xf32>
    %2 = arith.truncf %1 : vector<8x32xf32> to vector<8x32xbf16>
    %c0_2 = arith.constant 0 : index
    %c0_3 = arith.constant 0 : index
    %3 = vector.load %arg2[%c0_2, %c0_3] : memref<32x640xbf16, #tpu.memory_space<vmem>>, vector<32x640xbf16>
    %cst = arith.constant dense<0.000000e+00> : vector<8x640xf32>
    %4 = tpu.matmul %2, %3, %cst {dimension_numbers = #tpu.dot_dimension_numbers<[1], [0], [0], [1], [0, 0, 1, 1], [], []>} : vector<8x32xbf16>, vector<32x640xbf16>, vector<8x640xf32> -> vector<8x640xf32>
    %5 = vector.extract_strided_slice %4 {offsets = [0, 0], sizes = [8, 128], strides = [1, 1]} : vector<8x640xf32> to vector<8x128xf32>
    %6 = vector.extract_strided_slice %4 {offsets = [0, 128], sizes = [8, 128], strides = [1, 1]} : vector<8x640xf32> to vector<8x128xf32>
    %7 = vector.extract_strided_slice %4 {offsets = [0, 256], sizes = [8, 128], strides = [1, 1]} : vector<8x640xf32> to vector<8x128xf32>
    %8 = vector.extract_strided_slice %4 {offsets = [0, 384], sizes = [8, 128], strides = [1, 1]} : vector<8x640xf32> to vector<8x128xf32>
    %9 = vector.extract_strided_slice %4 {offsets = [0, 512], sizes = [8, 128], strides = [1, 1]} : vector<8x640xf32> to vector<8x128xf32>
    %c0_4 = arith.constant 0 : index
    %c0_5 = arith.constant 0 : index
    %10 = vector.load %arg3[%c0_4, %c0_5] : memref<8x128xf32, #tpu.memory_space<vmem>>, vector<8x128xf32>
    %c0_6 = arith.constant 0 : index
    %c0_7 = arith.constant 0 : index
    %11 = vector.load %arg4[%c0_6, %c0_7] : memref<8x128xf32, #tpu.memory_space<vmem>>, vector<8x128xf32>
    %12 = arith.mulf %5, %10 : vector<8x128xf32>
    %13 = arith.mulf %6, %11 : vector<8x128xf32>
    %14 = arith.addf %12, %13 : vector<8x128xf32>
    %15 = arith.mulf %7, %10 : vector<8x128xf32>
    %16 = arith.mulf %8, %11 : vector<8x128xf32>
    %17 = arith.addf %15, %16 : vector<8x128xf32>
    %18 = tpu.iota {dimensions = array<i32: 0>} : vector<8x8xi32>
    %19 = tpu.iota {dimensions = array<i32: 1>} : vector<8x8xi32>
    %20 = arith.cmpi sle, %19, %18 : vector<8x8xi32>
    %21 = vector.extract_strided_slice %14 {offsets = [0, 0], sizes = [8, 32], strides = [1, 1]} : vector<8x128xf32> to vector<8x32xf32>
    %22 = arith.truncf %21 : vector<8x32xf32> to vector<8x32xbf16>
    %23 = vector.extract_strided_slice %17 {offsets = [0, 0], sizes = [8, 32], strides = [1, 1]} : vector<8x128xf32> to vector<8x32xf32>
    %24 = arith.truncf %23 : vector<8x32xf32> to vector<8x32xbf16>
    %25 = vector.extract_strided_slice %9 {offsets = [0, 0], sizes = [8, 32], strides = [1, 1]} : vector<8x128xf32> to vector<8x32xf32>
    %26 = arith.truncf %25 : vector<8x32xf32> to vector<8x32xbf16>
    %cst_8 = arith.constant dense<0.000000e+00> : vector<8x8xf32>
    %27 = tpu.matmul %22, %24, %cst_8 {dimension_numbers = #tpu.dot_dimension_numbers<[1], [1], [0], [0], [0, 0, 1, 0], [], []>} : vector<8x32xbf16>, vector<8x32xbf16>, vector<8x8xf32> -> vector<8x8xf32>
    %cst_9 = arith.constant 0xFF800000 : f32
    %28 = vector.broadcast %cst_9 : f32 to vector<8x8xf32>
    %29 = arith.select %20, %27, %28 : vector<8x8xi1>, vector<8x8xf32>
    %cst_10 = arith.constant dense<0xFF800000> : vector<8xf32>
    %30 = vector.multi_reduction <maximumf>, %29, %cst_10 [1] : vector<8x8xf32> to vector<8xf32>
    %31 = vector.shape_cast %30 : vector<8xf32> to vector<8x1xf32>
    %32 = vector.broadcast %31 : vector<8x1xf32> to vector<8x8xf32>
    %33 = arith.subf %29, %32 : vector<8x8xf32>
    %34 = math.exp %33 : vector<8x8xf32>
    %cst_11 = arith.constant dense<0.000000e+00> : vector<8xf32>
    %35 = vector.multi_reduction <add>, %34, %cst_11 [1] : vector<8x8xf32> to vector<8xf32>
    %36 = vector.shape_cast %35 : vector<8xf32> to vector<8x1xf32>
    %37 = tpu.reciprocal %36 {approx = true} : vector<8x1xf32> -> vector<8x1xf32>
    %38 = vector.broadcast %37 : vector<8x1xf32> to vector<8x8xf32>
    %39 = arith.mulf %34, %38 : vector<8x8xf32>
    %40 = arith.truncf %39 : vector<8x8xf32> to vector<8x8xbf16>
    %cst_12 = arith.constant dense<0.000000e+00> : vector<8x32xf32>
    %41 = tpu.matmul %40, %26, %cst_12 {dimension_numbers = #tpu.dot_dimension_numbers<[1], [0], [0], [1], [0, 0, 1, 1], [], []>} : vector<8x8xbf16>, vector<8x32xbf16>, vector<8x32xf32> -> vector<8x32xf32>
    %42 = vector.extract_strided_slice %14 {offsets = [0, 32], sizes = [8, 32], strides = [1, 1]} : vector<8x128xf32> to vector<8x32xf32>
    %43 = arith.truncf %42 : vector<8x32xf32> to vector<8x32xbf16>
    %44 = vector.extract_strided_slice %17 {offsets = [0, 32], sizes = [8, 32], strides = [1, 1]} : vector<8x128xf32> to vector<8x32xf32>
    %45 = arith.truncf %44 : vector<8x32xf32> to vector<8x32xbf16>
    %46 = vector.extract_strided_slice %9 {offsets = [0, 32], sizes = [8, 32], strides = [1, 1]} : vector<8x128xf32> to vector<8x32xf32>
    %47 = arith.truncf %46 : vector<8x32xf32> to vector<8x32xbf16>
    %cst_13 = arith.constant dense<0.000000e+00> : vector<8x8xf32>
    %48 = tpu.matmul %43, %45, %cst_13 {dimension_numbers = #tpu.dot_dimension_numbers<[1], [1], [0], [0], [0, 0, 1, 0], [], []>} : vector<8x32xbf16>, vector<8x32xbf16>, vector<8x8xf32> -> vector<8x8xf32>
    %cst_14 = arith.constant 0xFF800000 : f32
    %49 = vector.broadcast %cst_14 : f32 to vector<8x8xf32>
    %50 = arith.select %20, %48, %49 : vector<8x8xi1>, vector<8x8xf32>
    %cst_15 = arith.constant dense<0xFF800000> : vector<8xf32>
    %51 = vector.multi_reduction <maximumf>, %50, %cst_15 [1] : vector<8x8xf32> to vector<8xf32>
    %52 = vector.shape_cast %51 : vector<8xf32> to vector<8x1xf32>
    %53 = vector.broadcast %52 : vector<8x1xf32> to vector<8x8xf32>
    %54 = arith.subf %50, %53 : vector<8x8xf32>
    %55 = math.exp %54 : vector<8x8xf32>
    %cst_16 = arith.constant dense<0.000000e+00> : vector<8xf32>
    %56 = vector.multi_reduction <add>, %55, %cst_16 [1] : vector<8x8xf32> to vector<8xf32>
    %57 = vector.shape_cast %56 : vector<8xf32> to vector<8x1xf32>
    %58 = tpu.reciprocal %57 {approx = true} : vector<8x1xf32> -> vector<8x1xf32>
    %59 = vector.broadcast %58 : vector<8x1xf32> to vector<8x8xf32>
    %60 = arith.mulf %55, %59 : vector<8x8xf32>
    %61 = arith.truncf %60 : vector<8x8xf32> to vector<8x8xbf16>
    %cst_17 = arith.constant dense<0.000000e+00> : vector<8x32xf32>
    %62 = tpu.matmul %61, %47, %cst_17 {dimension_numbers = #tpu.dot_dimension_numbers<[1], [0], [0], [1], [0, 0, 1, 1], [], []>} : vector<8x8xbf16>, vector<8x32xbf16>, vector<8x32xf32> -> vector<8x32xf32>
    %63 = vector.extract_strided_slice %14 {offsets = [0, 64], sizes = [8, 32], strides = [1, 1]} : vector<8x128xf32> to vector<8x32xf32>
    %64 = arith.truncf %63 : vector<8x32xf32> to vector<8x32xbf16>
    %65 = vector.extract_strided_slice %17 {offsets = [0, 64], sizes = [8, 32], strides = [1, 1]} : vector<8x128xf32> to vector<8x32xf32>
    %66 = arith.truncf %65 : vector<8x32xf32> to vector<8x32xbf16>
    %67 = vector.extract_strided_slice %9 {offsets = [0, 64], sizes = [8, 32], strides = [1, 1]} : vector<8x128xf32> to vector<8x32xf32>
    %68 = arith.truncf %67 : vector<8x32xf32> to vector<8x32xbf16>
    %cst_18 = arith.constant dense<0.000000e+00> : vector<8x8xf32>
    %69 = tpu.matmul %64, %66, %cst_18 {dimension_numbers = #tpu.dot_dimension_numbers<[1], [1], [0], [0], [0, 0, 1, 0], [], []>} : vector<8x32xbf16>, vector<8x32xbf16>, vector<8x8xf32> -> vector<8x8xf32>
    %cst_19 = arith.constant 0xFF800000 : f32
    %70 = vector.broadcast %cst_19 : f32 to vector<8x8xf32>
    %71 = arith.select %20, %69, %70 : vector<8x8xi1>, vector<8x8xf32>
    %cst_20 = arith.constant dense<0xFF800000> : vector<8xf32>
    %72 = vector.multi_reduction <maximumf>, %71, %cst_20 [1] : vector<8x8xf32> to vector<8xf32>
    %73 = vector.shape_cast %72 : vector<8xf32> to vector<8x1xf32>
    %74 = vector.broadcast %73 : vector<8x1xf32> to vector<8x8xf32>
    %75 = arith.subf %71, %74 : vector<8x8xf32>
    %76 = math.exp %75 : vector<8x8xf32>
    %cst_21 = arith.constant dense<0.000000e+00> : vector<8xf32>
    %77 = vector.multi_reduction <add>, %76, %cst_21 [1] : vector<8x8xf32> to vector<8xf32>
    %78 = vector.shape_cast %77 : vector<8xf32> to vector<8x1xf32>
    %79 = tpu.reciprocal %78 {approx = true} : vector<8x1xf32> -> vector<8x1xf32>
    %80 = vector.broadcast %79 : vector<8x1xf32> to vector<8x8xf32>
    %81 = arith.mulf %76, %80 : vector<8x8xf32>
    %82 = arith.truncf %81 : vector<8x8xf32> to vector<8x8xbf16>
    %cst_22 = arith.constant dense<0.000000e+00> : vector<8x32xf32>
    %83 = tpu.matmul %82, %68, %cst_22 {dimension_numbers = #tpu.dot_dimension_numbers<[1], [0], [0], [1], [0, 0, 1, 1], [], []>} : vector<8x8xbf16>, vector<8x32xbf16>, vector<8x32xf32> -> vector<8x32xf32>
    %84 = vector.extract_strided_slice %14 {offsets = [0, 96], sizes = [8, 32], strides = [1, 1]} : vector<8x128xf32> to vector<8x32xf32>
    %85 = arith.truncf %84 : vector<8x32xf32> to vector<8x32xbf16>
    %86 = vector.extract_strided_slice %17 {offsets = [0, 96], sizes = [8, 32], strides = [1, 1]} : vector<8x128xf32> to vector<8x32xf32>
    %87 = arith.truncf %86 : vector<8x32xf32> to vector<8x32xbf16>
    %88 = vector.extract_strided_slice %9 {offsets = [0, 96], sizes = [8, 32], strides = [1, 1]} : vector<8x128xf32> to vector<8x32xf32>
    %89 = arith.truncf %88 : vector<8x32xf32> to vector<8x32xbf16>
    %cst_23 = arith.constant dense<0.000000e+00> : vector<8x8xf32>
    %90 = tpu.matmul %85, %87, %cst_23 {dimension_numbers = #tpu.dot_dimension_numbers<[1], [1], [0], [0], [0, 0, 1, 0], [], []>} : vector<8x32xbf16>, vector<8x32xbf16>, vector<8x8xf32> -> vector<8x8xf32>
    %cst_24 = arith.constant 0xFF800000 : f32
    %91 = vector.broadcast %cst_24 : f32 to vector<8x8xf32>
    %92 = arith.select %20, %90, %91 : vector<8x8xi1>, vector<8x8xf32>
    %cst_25 = arith.constant dense<0xFF800000> : vector<8xf32>
    %93 = vector.multi_reduction <maximumf>, %92, %cst_25 [1] : vector<8x8xf32> to vector<8xf32>
    %94 = vector.shape_cast %93 : vector<8xf32> to vector<8x1xf32>
    %95 = vector.broadcast %94 : vector<8x1xf32> to vector<8x8xf32>
    %96 = arith.subf %92, %95 : vector<8x8xf32>
    %97 = math.exp %96 : vector<8x8xf32>
    %cst_26 = arith.constant dense<0.000000e+00> : vector<8xf32>
    %98 = vector.multi_reduction <add>, %97, %cst_26 [1] : vector<8x8xf32> to vector<8xf32>
    %99 = vector.shape_cast %98 : vector<8xf32> to vector<8x1xf32>
    %100 = tpu.reciprocal %99 {approx = true} : vector<8x1xf32> -> vector<8x1xf32>
    %101 = vector.broadcast %100 : vector<8x1xf32> to vector<8x8xf32>
    %102 = arith.mulf %97, %101 : vector<8x8xf32>
    %103 = arith.truncf %102 : vector<8x8xf32> to vector<8x8xbf16>
    %cst_27 = arith.constant dense<0.000000e+00> : vector<8x32xf32>
    %104 = tpu.matmul %103, %89, %cst_27 {dimension_numbers = #tpu.dot_dimension_numbers<[1], [0], [0], [1], [0, 0, 1, 1], [], []>} : vector<8x8xbf16>, vector<8x32xbf16>, vector<8x32xf32> -> vector<8x32xf32>
    %105 = tpu.concatenate %41, %62, %83, %104 in 1 : vector<8x32xf32>, vector<8x32xf32>, vector<8x32xf32>, vector<8x32xf32> -> vector<8x128xf32>
    %106 = arith.truncf %105 : vector<8x128xf32> to vector<8x128xbf16>
    %c0_28 = arith.constant 0 : index
    %c0_29 = arith.constant 0 : index
    %107 = vector.load %arg5[%c0_28, %c0_29] : memref<128x32xbf16, #tpu.memory_space<vmem>>, vector<128x32xbf16>
    %cst_30 = arith.constant dense<0.000000e+00> : vector<8x32xf32>
    %108 = tpu.matmul %106, %107, %cst_30 {dimension_numbers = #tpu.dot_dimension_numbers<[1], [0], [0], [1], [0, 0, 1, 1], [], []>} : vector<8x128xbf16>, vector<128x32xbf16>, vector<8x32xf32> -> vector<8x32xf32>
    %c0_31 = arith.constant 0 : index
    %c0_32 = arith.constant 0 : index
    %109 = vector.load %arg6[%c0_31, %c0_32] : memref<1x32xf32, #tpu.memory_space<vmem>>, vector<1x32xf32>
    %110 = vector.broadcast %109 : vector<1x32xf32> to vector<8x32xf32>
    %111 = arith.addf %108, %110 : vector<8x32xf32>
    %c0_33 = arith.constant 0 : index
    %c0_34 = arith.constant 0 : index
    %c0_35 = arith.constant 0 : index
    %112 = vector.load %arg7[%c0_33, %c0_34, %c0_35] : memref<1x8x32xf32, #tpu.memory_space<vmem>>, vector<1x8x32xf32>
    %113 = vector.shape_cast %112 : vector<1x8x32xf32> to vector<8x32xf32>
    %114 = vector.shape_cast %111 : vector<8x32xf32> to vector<1x8x32xf32>
    tpu.vector_store %arg7[%c0_33, %c0_34, %c0_35], %114 {strides = array<i32>} : memref<1x8x32xf32, #tpu.memory_space<vmem>>, vector<1x8x32xf32>,
    return
  }
  func.func @transform_0(%arg0: i32) -> (i32, i32, i32) {
    %c0_i32 = arith.constant 0 : i32
    %c0_i32_0 = arith.constant 0 : i32
    %c0_i32_1 = arith.constant 0 : i32
    return %arg0, %c0_i32, %c0_i32_0 : i32, i32, i32
  }
  func.func @transform_1(%arg0: i32) -> (i32, i32) {
    %c0_i32 = arith.constant 0 : i32
    %c0_i32_0 = arith.constant 0 : i32
    %c0_i32_1 = arith.constant 0 : i32
    return %c0_i32, %c0_i32_0 : i32, i32
  }
  func.func @transform_2(%arg0: i32) -> (i32, i32) {
    %c0_i32 = arith.constant 0 : i32
    %c0_i32_0 = arith.constant 0 : i32
    %c0_i32_1 = arith.constant 0 : i32
    return %c0_i32, %c0_i32_0 : i32, i32
  }
  func.func @transform_3(%arg0: i32) -> (i32, i32) {
    %c0_i32 = arith.constant 0 : i32
    %c0_i32_0 = arith.constant 0 : i32
    %c0_i32_1 = arith.constant 0 : i32
    return %c0_i32, %c0_i32_0 : i32, i32
  }
  func.func @transform_4(%arg0: i32) -> (i32, i32) {
    %c0_i32 = arith.constant 0 : i32
    %c0_i32_0 = arith.constant 0 : i32
    %c0_i32_1 = arith.constant 0 : i32
    return %c0_i32, %c0_i32_0 : i32, i32
  }
  func.func @transform_5(%arg0: i32) -> (i32, i32) {
    %c0_i32 = arith.constant 0 : i32
    %c0_i32_0 = arith.constant 0 : i32
    %c0_i32_1 = arith.constant 0 : i32
    return %c0_i32, %c0_i32_0 : i32, i32
  }
  func.func @transform_6(%arg0: i32) -> (i32, i32, i32) {
    %c0_i32 = arith.constant 0 : i32
    %c0_i32_0 = arith.constant 0 : i32
    %c0_i32_1 = arith.constant 0 : i32
    return %arg0, %c0_i32, %c0_i32_0 : i32, i32, i32
  }
}

</mosaic_0001>

<bundles_post_ra>
// kernel: tpu_custom_call.1
= control target key start
LH: loop header
LB: loop body
LE: loop exit
PB: predicated region body
PF: predicated region fallthrough
CT: control target
= control target key end

     0   :  { %11 = vsyncpa [#allocation3], 0  ;;  %s1927_s0 = inlined_call_operand.hbm [shape: f32[2,8,32], index: 0, kind: input, shape index: {}]   ;;  %s1928_s1 = inlined_call_operand.vmem [shape: bf16[32,640], index: 1, kind: input, shape index: {}]   ;;  %s1929_s2 = inlined_call_operand.hbm [shape: f32[8,128], index: 2, kind: input, shape index: {}]   ;;  %s1930_s3 = inlined_call_operand.vmem [shape: f32[8,128], index: 3, kind: input, shape index: {}]   ;;  %s1931_s4 = inlined_call_operand.vmem [shape: bf16[128,32], index: 4, kind: input, shape index: {}]   ;;  %s1932_s5 = inlined_call_operand.vmem [shape: f32[1,32], index: 5, kind: input, shape index: {}]   ;;  %s1933_s6 = inlined_call_operand.hbm [shape: f32[2,8,32], index: 6, kind: output, shape index: {}]  }
   0x1   :  { %13 = vsyncpa [#allocation3 + $0x1], 0 }
   0x2   :  { %14 = vsyncpa [#allocation6], 0 }
   0x3   :  { %15 = vsyncpa [#allocation4], 0 }
   0x4   :  { %17 = vsyncpa [#allocation4 + $0x1], 0  ;;  %s1579_s21 = smov 0   ;;  %s1581_s22 = smov 0  }
   0x5   :  { %s1583_s23 = smov 0   ;;  %s1585_s24 = smov 0  }
   0x6 LB: > { %s1600_s25 = sadd.s32 4294967295, %s1533_s24   ;;  %s1156_s26 = sadd.s32 4294967294, %s1533_s24   ;;  %s1533_s24 = sphi %s1585_s24, %s1957_s24   ;;  %s1529_s23 = sphi %s1583_s23, %s1956_s23   ;;  %s1525_s22 = sphi %s1581_s22, %s1955_s22   ;;  %s1521_s21 = sphi %s1579_s21, %s1954_s21  }
   0x7   : > { %p43_p0 = scmp.ne.s32.totalorder %s1525_s22, %s1521_s21  ;;  %p1934_p1 = scmp.eq.s32.totalorder %s1600_s25, 0 }
   0x8   : > { %p178_p3 = scmp.eq.s32.totalorder %s1156_s26, 1  ;;  %p1157_p5 = scmp.ge.s32.totalorder %s1533_s24, 1 }
   0x9   : > { %p1609_p4 = por %p1934_p1, %p43_p0  ;;  %p185_p7 = scmp.lt.s32.totalorder %s1533_s24, 3 }
   0xa   : > { %p1614_p6 = por %p178_p3, %p43_p0  ;;  %s1535_s30 = smov [#allocation5]  }
   0xb   : > { %s1937_s27 = scalar_select %p1609_p4, 1, 0 }
   0xc   : > { %s1938_s28 = scalar_select %p1614_p6, 1, 0 }
   0xd   : > { %p1619_p8 = pnand %p1157_p5, %p185_p7  ;;  %s201_s7 = sshll.u32 %s1535_s30, 4  ;;  %s202_s7 = int_to_ptr.vmem [resolvable:$true] %s201_s7 }
   0xe   : > { %s1627_s8 = sadd.s32 1, %s1533_s24   ;;  %s30_s12 = sadd.s32 1, %s1529_s23 }
   0xf   : > { %s1939_s29 = scalar_select %p1619_p8, 1, 0 }
  0x10   : > { %p1312_p10 = pneg %p1619_p8  ;;  %s27_s10 = ssub.s32 %s1533_s24, %s1627_s8 }
  0x11   : > { %p1637_p12 = scmp.eq.s32.totalorder %s27_s10, 0  ;;  %s1405_s15 = scalar_lea.hbm %s1929_s2, 128 }
  0x12   : > { %p1631_p11 = pnand %p1312_p10, %p1934_p1  ;;  %p1406_p0 = scmp.ne.s32.totalorder %s1929_s2, %s1405_s15 }
  0x13   : > { %s1941_s11 = scalar_select %p1637_p12, 1, 0 }
  0x14   : > { %p1407_p3 = pneg %p1631_p11  ;;  %p1412_p10 = scmp.lt.u32.totalorder %s1405_s15, %s1929_s2 }
  0x16   : > { %p1408_p5 = pnand %p1407_p3, %p1406_p0 }
  0x18   : > { %p1409_p7 = pneg %p1408_p5 }
  0x1a   : > { %p1414_p9 = pnand %p1412_p10, %p1409_p7 }
  0x1c   : > { %1417 = shalt.err (!%p1414_p9)
}
  0x1d   : > { %s1418_s20 = scalar_lea.vmem %s202_s7, 128  ;;  %p1426_p6 = scmp.lt.s32.totalorder %s202_s7, %s202_s7 }
  0x1e   : > { %p1419_p1 = scmp.ne.s32.totalorder %s202_s7, %s1418_s20  ;;  %p1427_p4 = scmp.lt.s32.totalorder %s1418_s20, %s1418_s20 }
  0x20   : > { %p1421_p2 = pnand %p1419_p1, %p1407_p3  ;;  %p1428_p8 = por %p1427_p4, %p1426_p6 }
  0x22   : > { %p1422_p13 = pneg %p1421_p2 }
  0x24   : > { %p1429_p12 = pnand %p1428_p8, %p1422_p13 }
  0x26   : > { %1432 = shalt.err (!%p1429_p12)
}
  0x27   : > { %1315 = dma.hbm_to_vmem [thread:$0]  (!%p1631_p11), %s1929_s2, 128, %s202_s7, [#allocation6]  }
  0x28   : > { %p1942_p1 = scmp.ne.s32.totalorder %s1941_s11, 0  ;;  %p38_p2 = scmp.eq.s32.totalorder %s1533_s24, 0 }
  0x29   : > { %p1943_p4 = scmp.ne.s32.totalorder %s1529_s23, %s1525_s22  ;;  %p1944_p6 = scmp.eq.s32.totalorder %s1600_s25, 1 }
  0x2a   : > { %s1663_s10 = scalar_select %p1942_p1, %s1529_s23, %s30_s12  }
  0x2b   : > { %p1671_p8 = por %p1944_p6, %p1943_p4  ;;  %p1325_p9 = scmp.lt.s32.totalorder %s1533_s24, 2 }
  0x2c   : > { %s221_s13 = sand.u32 1, %s1529_s23   ;;  %p1946_p12 = pmov %p1943_p4 }
  0x2d   : > { %s1160_s14 = sshll.u32 %s221_s13, 3  ;;  %s1161_s15 = sshll.u32 %s1533_s24, 7 }
  0x2e   : > { %p39_p13 = por %p38_p2, %p1946_p12  ;;  %s1684_s7 = scalar_lea.hbm %s1927_s0, %s1161_s15 }
  0x2f   : > { %s225_s11 = scalar_lea.vmem [#allocation2], %s1160_s14  ;;  %s222_s19 = scalar_lea.sflag [#allocation3], %s221_s13 }
  0x30   : > { %s232_s12 = sshll.u32 %s225_s11, 4  ;;  %p1686_p11 = pnand %p1325_p9, %p39_p13  ;;  %s1690_s12 = int_to_ptr.vmem [resolvable:$true] %s232_s12 }
  0x31   : > { %s1433_s20 = scalar_lea.hbm %s1684_s7, 128  ;;  %s1438_s14 = scalar_lea.hbm %s1927_s0, 256 }
  0x32   : > { %p1434_p0 = scmp.ne.s32.totalorder %s1684_s7, %s1433_s20  ;;  %p1435_p3 = pneg %p1686_p11 }
  0x33   : > { %p1439_p10 = scmp.lt.u32.totalorder %s1684_s7, %s1927_s0  ;;  %p1440_p1 = scmp.lt.u32.totalorder %s1438_s14, %s1433_s20 }
  0x34   : > { %p1436_p5 = pnand %p1435_p3, %p1434_p0  ;;  %p1442_p4 = scmp.lt.u32.totalorder %s1433_s20, %s1684_s7 }
  0x35   : > { %p1441_p2 = por %p1440_p1, %p1439_p10 }
  0x36   : > { %p1437_p7 = pneg %p1436_p5 }
  0x37   : > { %p1443_p6 = por %p1442_p4, %p1441_p2 }
  0x39   : > { %p1444_p9 = pnand %p1443_p6, %p1437_p7 }
  0x3b   : > { %1447 = shalt.err (!%p1444_p9)
}
  0x3c   : > { %s1448_s13 = scalar_lea.vmem %s1690_s12, 128  ;;  %s1536_s17 = smov [#allocation2]  }
  0x3d   : > { %p1449_p12 = scmp.ne.s32.totalorder %s1690_s12, %s1448_s13  ;;  %s1453_s11 = sshll.u32 %s1536_s17, 4  ;;  %s1454_s11 = int_to_ptr.vmem [resolvable:$false] %s1453_s11 }
  0x3e   : > { %s1455_s26 = scalar_lea.vmem %s1454_s11, 256  ;;  %p1456_p5 = scmp.lt.s32.totalorder %s1690_s12, %s1454_s11 }
  0x3f   : > { %p1451_p13 = pnand %p1449_p12, %p1435_p3  ;;  %p1457_p10 = scmp.lt.s32.totalorder %s1455_s26, %s1448_s13 }
  0x41   : > { %p1452_p0 = pneg %p1451_p13  ;;  %p1458_p1 = por %p1457_p10, %p1456_p5 }
  0x43   : > { %p1459_p2 = pnand %p1458_p1, %p1452_p0 }
  0x45   : > { %1462 = shalt.err (!%p1459_p2)
}
  0x46   : > { %1319 = dma.hbm_to_vmem [thread:$0]  (!%p1686_p11), %s1684_s7, 128, %s1690_s12, %s222_s19  }
  0x47   : > { %p1948_p7 = scmp.ne.s32.totalorder %s1939_s29, 0 }
  0x48   : > { %s1720_s20 = sand.u32 (!%p1948_p7), 1, %s1525_s22   ;;  %p1949_p3 = scmp.ne.s32.totalorder (!%p1948_p7), %s1937_s27, 0 }
  0x49   : > { %241 = sbr.rel (%p1948_p7) target bundleno = 1547 (0x60b), region = 44  ;;  %s1163_s30 = sshll.u32 (!%p1948_p7), %s1720_s20, 3 }
  0x4a   : > { %s244_s14 = scalar_lea.sflag (!%p1948_p7), [#allocation3], %s1720_s20  ;;  %s247_s15 = scalar_lea.vmem (!%p1948_p7), [#allocation2], %s1163_s30 }
  0x50   : > { %1508 = dma.done.wait (%p1949_p3), %s244_s14, 128  }
  0x51   : > { %1510 = vsyncadd (%p1949_p3), %s244_s14, 4294967168  ;;  %p1950_p11 = scmp.eq.s32.totalorder %s1600_s25, 0 }
  0x53   : > { %1512 = dma.done.wait (%p1950_p11), [#allocation6], 128   ;;  %p1951_p4 = pmov %p1950_p11 }
  0x54   : > { %v1537_v0 = vmov 0   ;;  %v1367_v1 = vld [vmem:[%s1928_s1 + $0x4] ss:$20 sps:$4 sm:$0xff]   ;;  %v1369_v2 = vld [vmem:[%s1928_s1] ss:$20 sps:$4 sm:$0xff]   ;;  %vm347_vm0 = vcmask 261120   ;;  %v481_v42 = vlaneseq }
  0x55   : > { %1514 = vsyncadd (%p1951_p4), [#allocation6], 4294967168  ;;  %383 = vmatprep.mubr.bf16.mxu0 %v1537_v0  ;;  %351 = vmatprep.subr.bf16.mxu0 %v1367_v1  ;;  %v1370_v3 = vld [vmem:[%s1928_s1 + $0x2c] ss:$20 sps:$4 sm:$0xff]   ;;  %v1372_v4 = vld [vmem:[%s1928_s1 + $0x28] ss:$20 sps:$4 sm:$0xff]  }
  0x56   : > { %352 = vmatpush1.bf16.msra.mxu0 %v1369_v2  ;;  %v281_v5 = vld [vmem:[%s247_s15] sm:$0xff]  ;;  %v1538_v11 = vmov 0.0   ;;  %vm1539_vm1 = vmmov 0   ;;  %v473_v12 = vld [vmem:[#allocation5] sm:$0xff]  ;;  %s1540_s27 = smov 64   ;;  %s1541_s16 = smov 96  }
  0x57   : > { %353 = vmatprep.subr.bf16.mxu0 %v1370_v3  ;;  %v1375_v6 = vld [vmem:[%s1928_s1 + $0xc] ss:$20 sps:$4 sm:$0xff]   ;;  %v1373_v7 = vld [vmem:[%s1928_s1 + $0x8] ss:$20 sps:$4 sm:$0xff]   ;;  %v282_v8 = vpack.c.bf16 %v281_v5, %v281_v5  ;;  %v1376_v10 = vld [vmem:[%s1928_s1 + $0x30] ss:$20 sps:$4 sm:$0xff]   ;;  %1236 = vmatprep.subr.bf16.mxu1 %v1538_v11 }
  0x58   : > { %v1378_v9 = vld [vmem:[%s1928_s1 + $0x34] ss:$20 sps:$4 sm:$0xff]   ;;  %1238 = vmatprep.mubr.msk.bf16.mxu1 %vm1539_vm1, %v1538_v11  ;;  %v474_v13 = vld [vmem:[%s1930_s3] sm:$0xff]  ;;  %s1542_s13 = smov 32   ;;  %v1380_v32 = vld [vmem:[%s1928_s1 + $0x38] ss:$20 sps:$4 sm:$0xff]  }
  0x59   : > { %v1379_v31 = vld [vmem:[%s1928_s1 + $0x10] ss:$20 sps:$4 sm:$0xff]   ;;  %v482_v43 = vshrl.u32 %v481_v42, 7  ;;  %v484_v44 = vand.u32 127, %v481_v42  ;;  %vm536_vm3 = vcmask 64512   ;;  %vm552_vm4 = vcmask 1043456  }
  0x5a   : > { %354 = vmatpush1.bf16.msra.mxu0 %v1372_v4  ;;  %vm945_vm5 = vcmask 523264   ;;  %vm947_vm6 = vcmask 785408   ;;  %s279_s17 = scalar_lea.vmem [#allocation7], %s1163_s30  ;;  %s1543_s7 = smov [#allocation7]  }
  0x5b   : > { %392 = vmatprep.subr.bf16.mxu0 %v1375_v6  ;;  %vm485_vm2 = vcmp.le.s32.totalorder %v484_v44, %v482_v43  ;;  %s1076_s11 = sshll.u32 %s279_s17, 4  ;;  %s1467_s12 = sshll.u32 %s1543_s7, 4  ;;  %s1884_s11 = int_to_ptr.vmem [resolvable:$true] %s1076_s11  ;;  %s1468_s12 = int_to_ptr.vmem [resolvable:$false] %s1467_s12 }
  0x5c   : > { %s1463_s30 = scalar_lea.vmem %s1884_s11, 128  ;;  %s1469_s18 = scalar_lea.vmem %s1468_s12, 256 }
  0x5d   : > { %1176 = vmatmul.mubr.msk.bf16.vlgmr.msra.gmra.mrb[0].mxu0 %vm347_vm0, %v282_v8  ;;  %p1464_p6 = scmp.ne.s32.totalorder %s1884_s11, %s1463_s30  ;;  %p1470_p13 = scmp.lt.s32.totalorder %s1884_s11, %s1468_s12 }
  0x5e   : > { %393 = vmatpush1.bf16.msra.mxu0 %v1373_v7  ;;  %424 = vmatprep.mubr.bf16.mxu0 %v1537_v0  ;;  %p1471_p0 = scmp.lt.s32.totalorder %s1469_s18, %s1463_s30 }
  0x5f   : > { %394 = vmatprep.subr.bf16.mxu0 %v1378_v9  ;;  %p1465_p9 = pnand %p1464_p6, %p1671_p8 }
  0x60   : > { %p1472_p5 = por %p1471_p0, %p1470_p13 }
  0x61   : > { %p1466_p12 = pneg %p1465_p9 }
  0x62   : > { %395 = vmatpush1.bf16.msra.mxu0 %v1376_v10 }
  0x63   : > { %1228 = vmatprep.subr.bf16.mxu0 %v1538_v11  ;;  %p1473_p10 = pnand %p1472_p5, %p1466_p12 }
  0x65   : > { %1177 = vmatmul.mubr.msk.bf16.vlgmr.msra.gmra.mrb[4].mxu0 %vm347_vm0, %v282_v8 }
  0x66   : > { %1232 = vmatprep.mubr.msk.bf16.mxu0 %vm1539_vm1, %v1538_v11  ;;  %1229 = vmatpush3.bf16.msra.mxu0 %v1379_v31 }
  0x67   : > { %1230 = vmatprep.subr.bf16.mxu0 %v1538_v11 }
  0x6a   : > { %1231 = vmatpush3.bf16.msra.mxu0 %v1380_v32 }
  0x6b   : > { %1242 = vmatprep.subr.bf16.mxu0 %v1538_v11 }
  0x6d   : > { %1233 = vmatmul.mubr.msk.bf16.vlgmr.msra.gmra.mrb[8].mxu0 %vm347_vm0, %v282_v8 }
  0x6e   : > { %1244 = vmatprep.mubr.msk.bf16.mxu0 %vm1539_vm1, %v1538_v11 }
 0x130   : > { %v385_v14 = vpop.f32.mrb[0].mxu0 }
 0x131   : > { %v475_v15 = vmul.f32 %v473_v12, %v385_v14  ;;  %v387_v16 = vpop.f32.mrb[1].mxu0 }
 0x132   : > { %v476_v17 = vmul.f32 %v474_v13, %v387_v16  ;;  %v389_v18 = vpop.f32.mrb[2].mxu0 }
 0x133   : > { %v390_v19 = vpop.f32.mrb[3].mxu0 }
 0x134   : > { %v477_v20 = vadd.f32 %v476_v17, %v475_v15 }
 0x136   : > { %v486_v30 = vpack.c.bf16 %v477_v20, %v477_v20 }
 0x138   : > { %v426_v21 = vpop.f32.mrb[4].mxu0 }
 0x139   : > { %v478_v22 = vmul.f32 %v473_v12, %v426_v21  ;;  %v428_v23 = vpop.f32.mrb[5].mxu0 }
 0x13a   : > { %v479_v24 = vmul.f32 %v474_v13, %v428_v23  ;;  %v430_v25 = vpop.f32.mrb[6].mxu0 }
 0x13b   : > { %v431_v26 = vpop.f32.mrb[7].mxu0 }
 0x13c   : > { %v480_v27 = vadd.f32 %v479_v24, %v478_v22 }
 0x13e   : > { %v487_v28 = vpack.c.bf16 %v480_v27, %v480_v27 }
 0x140   : > { %712 = vrot.lane.b32.xlu1 %v487_v28, %s1540_s27  ;;  %600 = vrot.lane.b32.xlu0 %v487_v28, %s1541_s16  ;;  %v493_v29 = vsel %vm347_vm0, %v487_v28, 0  ;;  %v467_v51 = vpop.f32.mrb[8].mxu0 }
 0x141   : > { %1237 = vmatpush3.bf16.xpose.msra.mxu1 %v493_v29  ;;  %v488_v52 = vpack.c.bf16 %v467_v51, %v467_v51  ;;  %v1234_v53 = vpop.f32.mrb[9].mxu0 }
 0x142   : > { %1248 = vmatprep.subr.bf16.mxu1 %v1538_v11  ;;  %v470_v54 = vpop.f32.mrb[10].mxu0 }
 0x143   : > { %v1235_v55 = vpop.f32.mrb[11].mxu0  ;;  %v554_v56 = vsel %vm552_vm4, %v488_v52, 0 }
 0x144   : > { %710 = vrot.lane.b32.xlu1 %v486_v30, %s1540_s27  ;;  %597 = vrot.lane.b32.xlu0 %v486_v30, %s1541_s16 }
 0x145   : > { %1243 = vmatpush3.bf16.msra.mxu0 %v554_v56 }
 0x146   : > { %1254 = vmatprep.subr.bf16.mxu0 %v1538_v11 }
 0x148   : > { %821 = vrot.lane.b32.xlu1 %v486_v30, %s1542_s13  ;;  %823 = vrot.lane.b32.xlu0 %v487_v28, %s1542_s13 }
 0x149   : > { %1239 = vmatmul.mubr.msk.bf16.vlgmr.msra.gmra.mrb[0].mxu1 %vm347_vm0, %v486_v30 }
 0x14a   : > { %1250 = vmatprep.mubr.msk.bf16.mxu1 %vm1539_vm1, %v1538_v11 }
 0x1b2   : > { %v601_v33 = vpop.permute.xlu0 %600  ;;  %v713_v35 = vpop.permute.xlu1 %712 }
 0x1b3   : > { %v606_v34 = vsel %vm347_vm0, %v601_v33, 0  ;;  %v718_v37 = vsel %vm347_vm0, %v713_v35, 0 }
 0x1b4   : > { %1249 = vmatpush3.bf16.xpose.msra.mxu1 %v606_v34 }
 0x1b5   : > { %1260 = vmatprep.subr.bf16.mxu1 %v1538_v11 }
 0x1b6   : > { %v598_v36 = vpop.permute.xlu0 %597  ;;  %v711_v39 = vpop.permute.xlu1 %710 }
 0x1ba   : > { %v824_v38 = vpop.permute.xlu0 %823  ;;  %v822_v41 = vpop.permute.xlu1 %821 }
 0x1bb   : > { %1251 = vmatmul.mubr.msk.bf16.vlgmr.msra.gmra.mrb[4].mxu1 %vm347_vm0, %v598_v36  ;;  %v829_v40 = vsel %vm347_vm0, %v824_v38, 0 }
 0x1bc   : > { %1261 = vmatpush3.bf16.xpose.msra.mxu1 %v718_v37  ;;  %1262 = vmatprep.mubr.msk.bf16.mxu1 %vm1539_vm1, %v1538_v11 }
 0x1bd   : > { %1272 = vmatprep.subr.bf16.mxu1 %v1538_v11 }
 0x1c3   : > { %1263 = vmatmul.mubr.msk.bf16.vlgmr.msra.gmra.mrb[8].mxu1 %vm347_vm0, %v711_v39 }
 0x1c4   : > { %1273 = vmatpush3.bf16.xpose.msra.mxu1 %v829_v40  ;;  %1274 = vmatprep.mubr.msk.bf16.mxu1 %vm1539_vm1, %v1538_v11 }
 0x1c5   : > { %1284 = vmatprep.subr.bf16.mxu1 %v1538_v11 }
 0x1cb   : > { %1275 = vmatmul.mubr.msk.bf16.vlgmr.msra.gmra.mrb[12].mxu1 %vm347_vm0, %v822_v41 }
 0x1cc   : > { %1300 = vmatprep.mubr.msk.bf16.mxu1 %vm1539_vm1, %v1538_v11 }
 0x21c   : > { %v529_v45 = vpop.f32.mrb[0].mxu1 }
 0x21d   : > { %v535_v46 = vsel %vm485_vm2, %v529_v45, -inf  ;;  %v1240_v47 = vpop.f32.mrb[1].mxu1 }
 0x21e   : > { %v532_v48 = vpop.f32.mrb[2].mxu1  ;;  %v537_v49 = vsel %vm536_vm3, %v535_v46, -inf }
 0x21f   : > { %538 = vmax.xlane.f32.xlu0 %v537_v49  ;;  %v1241_v50 = vpop.f32.mrb[3].mxu1 }
 0x28e   : > { %v642_v57 = vpop.f32.mrb[4].mxu1 }
 0x28f   : > { %v648_v58 = vsel %vm485_vm2, %v642_v57, -inf  ;;  %v1252_v59 = vpop.f32.mrb[5].mxu1 }
 0x290   : > { %v645_v60 = vpop.f32.mrb[6].mxu1  ;;  %v649_v61 = vsel %vm536_vm3, %v648_v58, -inf  ;;  %v1382_v59 = vld [vmem:[%s1931_s4 + $0x8] sm:$0xff]  }
 0x291   : > { %650 = vmax.xlane.f32.xlu1 %v649_v61  ;;  %v1253_v62 = vpop.f32.mrb[7].mxu1  ;;  %v1383_v60 = vld [vmem:[%s1931_s4 + $0x10] sm:$0xff]   ;;  %v1384_v61 = vld [vmem:[%s1931_s4 + $0x18] sm:$0xff]  }
 0x292   : > { %v1385_v62 = vld [vmem:[%s1931_s4 + $0x20] sm:$0xff]  }
 0x296   : > { %v754_v63 = vpop.f32.mrb[8].mxu1 }
 0x297   : > { %v760_v0 = vsel %vm485_vm2, %v754_v63, -inf  ;;  %v1264_v1 = vpop.f32.mrb[9].mxu1  ;;  %v1386_v63 = vld [vmem:[%s1931_s4 + $0x28] sm:$0xff]  }
 0x298   : > { %v757_v2 = vpop.f32.mrb[10].mxu1  ;;  %v761_v3 = vsel %vm536_vm3, %v760_v0, -inf }
 0x299   : > { %762 = vmax.xlane.f32.xlu0 %v761_v3  ;;  %v1265_v4 = vpop.f32.mrb[11].mxu1 }
 0x29e   : > { %v865_v5 = vpop.f32.mrb[12].mxu1 }
 0x29f   : > { %v871_v6 = vsel %vm485_vm2, %v865_v5, -inf  ;;  %v1276_v7 = vpop.f32.mrb[13].mxu1  ;;  %v1388_v5 = vld [vmem:[%s1931_s4 + $0x38] sm:$0xff]  }
 0x2a0   : > { %v868_v8 = vpop.f32.mrb[14].mxu1  ;;  %v872_v9 = vsel %vm536_vm3, %v871_v6, -inf }
 0x2a1   : > { %873 = vmax.xlane.f32.xlu0 %v872_v9  ;;  %v1277_v10 = vpop.f32.mrb[15].mxu1 }
 0x2ac   : > { %v539_v12 = vpop.xlane.xlu0 %538 }
 0x2ad   : > { %v540_v13 = vsub.f32 %v535_v46, %v539_v12 }
 0x2af   : > { %v541_v14 = vmul.f32 1.442695, %v540_v13 }
 0x2b1   : > { %1389 = vpow2.f32 %v541_v14 }
 0x2bb   : > { %v1390_v15 = vpop.eup %1389 }
 0x2bc   : > { %v543_v16 = vsel %vm536_vm3, %v1390_v15, 0.0 }
 0x2bd   : > { %544 = vadd.xlane.f32.xlu1 %v543_v16 }
 0x2ce   : > { %662 = vrot.lane.b32.xlu1 %v488_v52, %s1541_s16 }
 0x31e   : > { %v651_v17 = vpop.xlane.xlu1 %650 }
 0x31f   : > { %v652_v18 = vsub.f32 %v648_v58, %v651_v17  ;;  %v1381_v58 = vld [vmem:[%s1931_s4] sm:$0xff]  }
 0x320   : > { %1285 = vmatpush3.bf16.msra.mxu1 %v1381_v58 }
 0x321   : > { %v653_v19 = vmul.f32 1.442695, %v652_v18  ;;  %1286 = vmatprep.subr.bf16.mxu1 %v1538_v11 }
 0x323   : > { %1391 = vpow2.f32 %v653_v19 }
 0x324   : > { %1287 = vmatpush3.bf16.msra.mxu1 %v1382_v59 }
 0x325   : > { %1288 = vmatprep.subr.bf16.mxu1 %v1538_v11 }
 0x326   : > { %v763_v20 = vpop.xlane.xlu0 %762 }
 0x327   : > { %v764_v21 = vsub.f32 %v760_v0, %v763_v20  ;;  %v1387_v0 = vld [vmem:[%s1931_s4 + $0x30] sm:$0xff]  }
 0x328   : > { %1289 = vmatpush3.bf16.msra.mxu1 %v1383_v60 }
 0x329   : > { %v765_v22 = vmul.f32 1.442695, %v764_v21  ;;  %1290 = vmatprep.subr.bf16.mxu1 %v1538_v11  ;;  %v1187_v21 = vld [vmem:[%s1932_s5] ss:$0 sm:$0xff] }
 0x32b   : > { %1393 = vpow2.f32 %v765_v22 }
 0x32c   : > { %1291 = vmatpush3.bf16.msra.mxu1 %v1384_v61 }
 0x32d   : > { %v1392_v23 = vpop.eup %1391  ;;  %1292 = vmatprep.subr.bf16.mxu1 %v1538_v11 }
 0x32e   : > { %v874_v24 = vpop.xlane.xlu0 %873  ;;  %v655_v25 = vsel %vm536_vm3, %v1392_v23, 0.0 }
 0x32f   : > { %v875_v26 = vsub.f32 %v871_v6, %v874_v24  ;;  %656 = vadd.xlane.f32.xlu0 %v655_v25 }
 0x330   : > { %1293 = vmatpush3.bf16.msra.mxu1 %v1385_v62 }
 0x331   : > { %v876_v27 = vmul.f32 1.442695, %v875_v26  ;;  %1294 = vmatprep.subr.bf16.mxu1 %v1538_v11 }
 0x333   : > { %1395 = vpow2.f32 %v876_v27 }
 0x334   : > { %1295 = vmatpush3.bf16.msra.mxu1 %v1386_v63 }
 0x335   : > { %v1394_v28 = vpop.eup %1393  ;;  %1296 = vmatprep.subr.bf16.mxu1 %v1538_v11 }
 0x336   : > { %v767_v29 = vsel %vm536_vm3, %v1394_v28, 0.0 }
 0x337   : > { %768 = vadd.xlane.f32.xlu1 %v767_v29 }
 0x338   : > { %1297 = vmatpush3.bf16.msra.mxu1 %v1387_v0 }
 0x339   : > { %1298 = vmatprep.subr.bf16.mxu1 %v1538_v11 }
 0x33c   : > { %1299 = vmatpush3.bf16.msra.mxu1 %v1388_v5 }
 0x33d   : > { %v1396_v30 = vpop.eup %1395 }
 0x33e   : > { %v878_v31 = vsel %vm536_vm3, %v1396_v30, 0.0 }
 0x33f   : > { %879 = vadd.xlane.f32.xlu0 %v878_v31 }
 0x348   : > { %884 = vrot.lane.b32.xlu1 %v488_v52, %s1542_s13 }
 0x34a   : > { %v545_v32 = vpop.xlane.xlu1 %544 }
 0x34b   : > { %1397 = vrcp.f32 %v545_v32 }
 0x34e   : > { %v663_v34 = vpop.permute.xlu1 %662 }
 0x34f   : > { %v668_v37 = vsel %vm552_vm4, %v663_v34, 0 }
 0x355   : > { %v1398_v33 = vpop.eup %1397  ;;  %773 = vrot.lane.b32.xlu0 %v488_v52, %s1540_s27 }
 0x356   : > { %v547_v35 = vmul.f32 %v1398_v33, %v1390_v15 }
 0x358   : > { %v548_v36 = vpack.c.bf16 %v547_v35, %v547_v35 }
 0x35a   : > { %1245 = vmatmul.mubr.msk.bf16.vlgmr.msra.gmra.mrb[12].mxu0 %vm536_vm3, %v548_v36 }
 0x35b   : > { %1255 = vmatpush3.bf16.msra.mxu0 %v668_v37  ;;  %1256 = vmatprep.mubr.msk.bf16.mxu0 %vm1539_vm1, %v1538_v11 }
 0x35c   : > { %1266 = vmatprep.subr.bf16.mxu0 %v1538_v11 }
 0x3bc   : > { %v657_v38 = vpop.xlane.xlu0 %656 }
 0x3bd   : > { %1399 = vrcp.f32 %v657_v38 }
 0x3c4   : > { %v769_v39 = vpop.xlane.xlu1 %768 }
 0x3c5   : > { %1401 = vrcp.f32 %v769_v39 }
 0x3c7   : > { %v1400_v40 = vpop.eup %1399 }
 0x3c8   : > { %v659_v41 = vmul.f32 %v1400_v40, %v1392_v23  ;;  %v885_v48 = vpop.permute.xlu1 %884 }
 0x3c9   : > { %v890_v50 = vsel %vm552_vm4, %v885_v48, 0 }
 0x3ca   : > { %v660_v42 = vpack.c.bf16 %v659_v41, %v659_v41 }
 0x3cc   : > { %v880_v43 = vpop.xlane.xlu0 %879  ;;  %1257 = vmatmul.mubr.msk.bf16.vlgmr.msra.gmra.mrb[16].mxu0 %vm536_vm3, %v660_v42 }
 0x3cd   : > { %1403 = vrcp.f32 %v880_v43  ;;  %1268 = vmatprep.mubr.msk.bf16.mxu0 %vm1539_vm1, %v1538_v11 }
 0x3cf   : > { %v1402_v44 = vpop.eup %1401 }
 0x3d0   : > { %v771_v45 = vmul.f32 %v1402_v44, %v1394_v28  ;;  %v774_v46 = vpop.permute.xlu0 %773 }
 0x3d1   : > { %v779_v47 = vsel %vm552_vm4, %v774_v46, 0 }
 0x3d2   : > { %1267 = vmatpush3.bf16.msra.mxu0 %v779_v47  ;;  %v772_v49 = vpack.c.bf16 %v771_v45, %v771_v45 }
 0x3d3   : > { %1278 = vmatprep.subr.bf16.mxu0 %v1538_v11 }
 0x3d5   : > { %1269 = vmatmul.mubr.msk.bf16.vlgmr.msra.gmra.mrb[20].mxu0 %vm536_vm3, %v772_v49 }
 0x3d6   : > { %1279 = vmatpush3.bf16.msra.mxu0 %v890_v50  ;;  %1280 = vmatprep.mubr.msk.bf16.mxu0 %vm1539_vm1, %v1538_v11 }
 0x3d7   : > { %v1404_v51 = vpop.eup %1403 }
 0x3d8   : > { %v882_v52 = vmul.f32 %v1404_v51, %v1396_v30 }
 0x3da   : > { %v883_v53 = vpack.c.bf16 %v882_v52, %v882_v52 }
 0x3dd   : > { %1281 = vmatmul.mubr.msk.bf16.vlgmr.msra.gmra.mrb[24].mxu0 %vm536_vm3, %v883_v53 }
 0x42d   : > { %v590_v54 = vpop.f32.mrb[12].mxu0 }
 0x42e   : > { %v1246_v55 = vpop.f32.mrb[13].mxu0 }
 0x42f   : > { %v593_v56 = vpop.f32.mrb[14].mxu0 }
 0x430   : > { %v1247_v57 = vpop.f32.mrb[15].mxu0 }
 0x49f   : > { %v704_v1 = vpop.f32.mrb[16].mxu0 }
 0x4a0   : > { %933 = vrot.lane.b32.xlu1 %v704_v1, %s1542_s13  ;;  %v1258_v2 = vpop.f32.mrb[17].mxu0 }
 0x4a1   : > { %v707_v3 = vpop.f32.mrb[18].mxu0 }
 0x4a2   : > { %v1259_v4 = vpop.f32.mrb[19].mxu0 }
 0x4a8   : > { %v815_v6 = vpop.f32.mrb[20].mxu0 }
 0x4a9   : > { %937 = vrot.lane.b32.xlu0 %v815_v6, %s1540_s27  ;;  %v1270_v7 = vpop.f32.mrb[21].mxu0 }
 0x4aa   : > { %v818_v8 = vpop.f32.mrb[22].mxu0 }
 0x4ab   : > { %v1271_v9 = vpop.f32.mrb[23].mxu0 }
 0x4b0   : > { %v926_v10 = vpop.f32.mrb[24].mxu0 }
 0x4b1   : > { %941 = vrot.lane.b32.xlu1 %v926_v10, %s1541_s16  ;;  %v1282_v12 = vpop.f32.mrb[25].mxu0  ;;  %s1197_s16 = sshll.u32 %s1600_s25, 7  ;;  %s1063_s25 = scalar_lea.sflag [#allocation4], %s1720_s20 }
 0x4b2   : > { %v929_v13 = vpop.f32.mrb[26].mxu0  ;;  %s1882_s29 = scalar_lea.hbm %s1933_s6, %s1197_s16 }
 0x4b3   : > { %v1283_v14 = vpop.f32.mrb[27].mxu0 }
 0x512   : > { %v934_v11 = vpop.permute.xlu1 %933 }
 0x513   : > { %v944_v16 = vsel %vm347_vm0, %v590_v54, %v934_v11 }
 0x51b   : > { %v938_v15 = vpop.permute.xlu0 %937 }
 0x51c   : > { %v946_v17 = vsel %vm945_vm5, %v944_v16, %v938_v15 }
 0x523   : > { %v942_v18 = vpop.permute.xlu1 %941 }
 0x524   : > { %v948_v19 = vsel %vm947_vm6, %v946_v17, %v942_v18 }
 0x525   : > { %v949_v20 = vpack.c.bf16 %v948_v19, %v948_v19 }
 0x527   : > { %1301 = vmatmul.mubr.bf16.vlgmr.msra.gmra.mrb[16].mxu1 %v949_v20 }
 0x5fa   : > { %v1055_v22 = vpop.f32.mrb[16].mxu1 }
 0x5fb   : > { %v1056_v23 = vadd.f32 %v1187_v21, %v1055_v22  ;;  %v1302_v24 = vpop.f32.mrb[17].mxu1 }
 0x5fc   : > { %v1058_v25 = vpop.f32.mrb[18].mxu1 }
 0x5fd   : > { %v1303_v26 = vpop.f32.mrb[19].mxu1  ;;  %1061 = vst.msk [vmem:[%s279_s17] sm:$0xff] %vm347_vm0, %v1056_v23 }
 0x5fe   : > { %1476 = shalt.err (!%p1473_p10)
}
 0x5ff   : > { %s1477_s20 = scalar_lea.hbm %s1882_s29, 128  ;;  %s1481_s27 = scalar_lea.hbm %s1933_s6, 256 }
 0x600   : > { %p1478_p1 = scmp.ne.s32.totalorder %s1882_s29, %s1477_s20  ;;  %p1482_p3 = scmp.lt.u32.totalorder %s1882_s29, %s1933_s6 }
 0x601   : > { %p1483_p11 = scmp.lt.u32.totalorder %s1481_s27, %s1477_s20  ;;  %p1485_p6 = scmp.lt.u32.totalorder %s1477_s20, %s1882_s29 }
 0x602   : > { %p1479_p2 = pnand %p1478_p1, %p1671_p8 }
 0x603   : > { %p1484_p4 = por %p1483_p11, %p1482_p3 }
 0x604   : > { %p1480_p7 = pneg %p1479_p2 }
 0x605   : > { %p1486_p9 = por %p1485_p6, %p1484_p4 }
 0x607   : > { %p1487_p12 = pnand %p1486_p9, %p1480_p7 }
 0x609   : > { %1490 = shalt.err (!%p1487_p12)
}
 0x60a   : > { %1310 = dma.vmem_to_hbm [thread:$0]  (%p1671_p8), %s1884_s11, 128, %s1882_s29, %s1063_s25  }
 0x60b PF: > { %s1088_s17 = sand.u32 1, %s1521_s21   ;;  %p1952_p13 = scmp.ne.s32.totalorder %s1938_s28, 0 }
 0x60c   : > { %p1953_p0 = scmp.ge.s32.totalorder %s1533_s24, 2  ;;  %s1089_s26 = scalar_lea.sflag [#allocation4], %s1088_s17 }
 0x60e   : > { %p1321_p5 = pnand %p1953_p0, %p1952_p13 }
 0x610   : > { %1516 = dma.done.wait (!%p1321_p5), %s1089_s26, 128  }
 0x611   : > { %1518 = vsyncadd (!%p1321_p5), %s1089_s26, 4294967168  ;;  %p20_p10 = scmp.ge.s32.totalorder %s1627_s8, 4   ;;  %s1954_s21 = smov %s1525_s22 }
 0x612   : > { %s1955_s22 = smov %s1529_s23  ;;  %s1956_s23 = smov %s1663_s10 }
 0x613   : > { %s1957_s24 = smov %s1627_s8  ;;  %22 = sbr.rel (!%p20_p10) target bundleno = 6 (0x6), region = 93 }
 0x61a   :  { %1094 = vsyncpa [#allocation3], 1 }
 0x61b   :  { %1096 = vsyncpa [#allocation3 + $0x1], 1 }
 0x61c   :  { %1097 = vsyncpa [#allocation6], 1 }
 0x61d   :  { %1098 = vsyncpa [#allocation4], 1 }
 0x61e   :  { %1100 = vsyncpa [#allocation4 + $0x1], 1 }

</bundles_post_ra>
